<compile_context>
chip_gen: v7x
topology: tpu7x:2x2x1
jax: 0.10.0
libtpu: 0.0.40
codegen_flags: <defaults>
</compile_context>

<pallas_src>
import jax
import jax.numpy as jnp
from jax.experimental import pallas as pl
from jax.experimental.pallas import tpu as pltpu


C_IN = 64
C_MID = 32
C_OUT = 1


def _round_up(x, m):
    return ((x + m - 1) // m) * m


def da_img_head_kernel(x_ref, w1_ref, b1_ref, w2_ref, b2_ref, o_ref):
    # x_ref:  (C_IN, tm)    channel-major pixel tile for one batch element (lane-dense)
    # w1_ref: (C_MID, C_IN) conv1 weight (PyTorch (32,64,1,1) squeezed), resident
    # b1_ref: (C_MID, 1)
    # w2_ref: (C_MID, 1)    conv2 weight as a column
    # b2_ref: (C_OUT, 1)
    # o_ref:  (C_OUT, tm) = (1, tm) lane-dense output slab
    t = jnp.dot(w1_ref[...], x_ref[...], preferred_element_type=jnp.float32)  # (32, tm) on MXU
    t = jnp.maximum(t + b1_ref[...], 0.0)                                     # bias + ReLU (VPU)
    # 32 -> 1 conv as broadcast-multiply + sublane reduce (VPU/XLU); avoids an M=1 MXU tile.
    out = jnp.sum(t * w2_ref[...], axis=0, keepdims=True) + b2_ref[...]       # (1, tm)
    o_ref[...] = out.astype(o_ref.dtype)


def da_img_head(x_nchw, w1, b1, w2, b2, *, tm=16384):
    """
    Fused DAImgHead forward.

    x_nchw: (N, 64, H, W) float32
    w1: (32, 64)   conv1_da weight (1x1 kernel squeezed)
    b1: (32,)
    w2: (1, 32)    conv2_da weight (1x1 kernel squeezed)
    b2: (1,)
    returns: (N, 1, H, W) float32
    """
    N, C, H, W = x_nchw.shape
    assert C == C_IN
    HW = H * W

    # Free, contiguous view: (N, C, H, W) -> (N, C, H*W). No transpose, no pad.
    x3 = x_nchw.reshape(N, C_IN, HW)

    # Tile size: as large as the review's per-generation guidance allows (default 16384
    # is safe everywhere), capped so the total grid has >= 4 steps (2 per v7x TC after
    # "parallel" sharding) and always a multiple of 128 lanes. If HW is smaller than
    # the tile, use the full row (lane dim equal to the array dim is always legal).
    min_total_steps = 4
    tiles_wanted = max(1, -(-min_total_steps // N))            # ceil(4 / N)
    tm_cap = _round_up(pl.cdiv(HW, tiles_wanted), 128)
    tm_eff = max(128, min(_round_up(max(tm, 128), 128), tm_cap))
    if HW < tm_eff:
        tm_eff = HW                                            # full-row block
    num_tiles = pl.cdiv(HW, tm_eff)                            # partial last tile OK (masked store)

    b1_col = b1.reshape(C_MID, 1)
    w2_col = w2.reshape(C_MID, 1)
    b2_col = b2.reshape(C_OUT, 1)

    # Advisory cost: ~16 FLOP/byte -> memory bound; helps XLA schedule around the call.
    cost = pl.CostEstimate(
        flops=N * HW * (2 * C_IN * C_MID + 2 * C_MID),
        transcendentals=0,
        bytes_accessed=N * HW * (C_IN + C_OUT) * 4
        + (C_MID * C_IN + C_MID + C_MID + C_OUT) * 4,
    )

    out3 = pl.pallas_call(
        da_img_head_kernel,
        out_shape=jax.ShapeDtypeStruct((N, C_OUT, HW), jnp.float32),
        grid_spec=pltpu.PrefetchScalarGridSpec(
            num_scalar_prefetch=0,
            grid=(N, num_tiles),
            in_specs=[
                # Batch dim squeezed (None) -> kernel sees a 2-D (C_IN, tm) tile.
                pl.BlockSpec((None, C_IN, tm_eff), lambda n, i: (n, 0, i)),
                pl.BlockSpec((C_MID, C_IN), lambda n, i: (0, 0)),   # w1 (resident)
                pl.BlockSpec((C_MID, 1), lambda n, i: (0, 0)),      # b1
                pl.BlockSpec((C_MID, 1), lambda n, i: (0, 0)),      # w2 column
                pl.BlockSpec((C_OUT, 1), lambda n, i: (0, 0)),      # b2
            ],
            out_specs=pl.BlockSpec((None, C_OUT, tm_eff), lambda n, i: (n, 0, i)),
        ),
        compiler_params=pltpu.CompilerParams(
            dimension_semantics=("parallel", "parallel"),
        ),
        cost_estimate=cost,
    )(x3, w1, b1_col, w2_col, b2_col)

    # (N, 1, H*W) -> (N, 1, H, W): pure reshape (C_OUT == 1), no transpose.
    return out3.reshape(N, C_OUT, H, W)


def init_params(key):
    # Matches torch.nn.init.normal_(weight, std=0.001), constant_(bias, 0).
    # Weights kept in PyTorch layout with the 1x1 spatial dims squeezed:
    #   conv1_da.weight (32, 64, 1, 1) -> (32, 64); conv2_da.weight (1, 32, 1, 1) -> (1, 32).
    k1, k2 = jax.random.split(key)
    w1 = jax.random.normal(k1, (C_MID, C_IN), dtype=jnp.float32) * 0.001
    b1 = jnp.zeros((C_MID,), dtype=jnp.float32)
    w2 = jax.random.normal(k2, (C_OUT, C_MID), dtype=jnp.float32) * 0.001
    b2 = jnp.zeros((C_OUT,), dtype=jnp.float32)
    return w1, b1, w2, b2


def reference(x_nchw, w1, b1, w2, b2):
    # Pure-JAX reference of the PyTorch forward (1x1 convs as einsums).
    t = jnp.einsum("nchw,mc->nmhw", x_nchw, w1,
                   preferred_element_type=jnp.float32) + b1[None, :, None, None]
    t = jnp.maximum(t, 0.0)
    o = jnp.einsum("nmhw,om->nohw", t, w2,
                   preferred_element_type=jnp.float32) + b2[None, :, None, None]
    return o


if __name__ == "__main__":
    key = jax.random.PRNGKey(0)
    kx, kp = jax.random.split(key)

    N, H, W = 2, 16, 16
    x = jax.random.normal(kx, (N, C_IN, H, W), dtype=jnp.float32)
    w1, b1, w2, b2 = init_params(kp)

    out = da_img_head(x, w1, b1, w2, b2)
    out = jax.block_until_ready(out)

    ref = reference(x, w1, b1, w2, b2)
    assert out.shape == (N, 1, H, W), out.shape
    # Values are ~1e-5 scale (std=0.001 init); relative tolerance plus a small absolute
    # floor for near-cancellation elements.
    assert jnp.allclose(out, ref, rtol=2e-2, atol=1e-7), "mismatch vs reference"

    print("KERNEL_OK")
</pallas_src>

<mosaic_0001>
module attributes {stable_mosaic.version = 11 : i64} {
  func.func @da_img_head_kernel(%arg0: i32, %arg1: i32, %arg2: memref<1x64x128xf32, #tpu.memory_space<vmem>>, %arg3: memref<32x64xf32, #tpu.memory_space<vmem>>, %arg4: memref<32x1xf32, #tpu.memory_space<vmem>>, %arg5: memref<32x1xf32, #tpu.memory_space<vmem>>, %arg6: memref<1x1xf32, #tpu.memory_space<vmem>>, %arg7: memref<1x1x128xf32, #tpu.memory_space<vmem>>) attributes {dimension_semantics = [#tpu.dimension_semantics<parallel>, #tpu.dimension_semantics<parallel>], iteration_bounds = array<i64: 2, 2>, scalar_prefetch = 0 : i64, scratch_operands = 0 : i64, tpu.core_type = #tpu.core_type<tc>, window_params = [{transform_indices = @transform_0, window_bounds = array<i64: 1, 64, 128>}, {pipeline_mode = #tpu.pipeline_mode<synchronous>, transform_indices = @transform_1, window_bounds = array<i64: 32, 64>}, {pipeline_mode = #tpu.pipeline_mode<synchronous>, transform_indices = @transform_2, window_bounds = array<i64: 32, 1>}, {pipeline_mode = #tpu.pipeline_mode<synchronous>, transform_indices = @transform_3, window_bounds = array<i64: 32, 1>}, {pipeline_mode = #tpu.pipeline_mode<synchronous>, transform_indices = @transform_4, window_bounds = array<i64: 1, 1>}, {transform_indices = @transform_5, window_bounds = array<i64: 1, 1, 128>}]} {
    %c0 = arith.constant 0 : index
    %c0_0 = arith.constant 0 : index
    %0 = vector.load %arg3[%c0, %c0_0] : memref<32x64xf32, #tpu.memory_space<vmem>>, vector<32x64xf32>
    %c0_1 = arith.constant 0 : index
    %c0_2 = arith.constant 0 : index
    %c0_3 = arith.constant 0 : index
    %1 = vector.load %arg2[%c0_1, %c0_2, %c0_3] : memref<1x64x128xf32, #tpu.memory_space<vmem>>, vector<1x64x128xf32>
    %2 = vector.shape_cast %1 : vector<1x64x128xf32> to vector<64x128xf32>
    %cst = arith.constant dense<0.000000e+00> : vector<32x128xf32>
    %3 = tpu.matmul %0, %2, %cst {dimension_numbers = #tpu.dot_dimension_numbers<[1], [0], [0], [1], [0, 0, 1, 1], [], []>} : vector<32x64xf32>, vector<64x128xf32>, vector<32x128xf32> -> vector<32x128xf32>
    %c0_4 = arith.constant 0 : index
    %c0_5 = arith.constant 0 : index
    %4 = vector.load %arg4[%c0_4, %c0_5] : memref<32x1xf32, #tpu.memory_space<vmem>>, vector<32x1xf32>
    %5 = vector.broadcast %4 : vector<32x1xf32> to vector<32x128xf32>
    %6 = arith.addf %3, %5 : vector<32x128xf32>
    %cst_6 = arith.constant 0.000000e+00 : f32
    %7 = vector.broadcast %cst_6 : f32 to vector<32x128xf32>
    %8 = arith.maximumf %6, %7 : vector<32x128xf32>
    %c0_7 = arith.constant 0 : index
    %c0_8 = arith.constant 0 : index
    %9 = vector.load %arg5[%c0_7, %c0_8] : memref<32x1xf32, #tpu.memory_space<vmem>>, vector<32x1xf32>
    %10 = vector.broadcast %9 : vector<32x1xf32> to vector<32x128xf32>
    %11 = arith.mulf %8, %10 : vector<32x128xf32>
    %cst_9 = arith.constant dense<0.000000e+00> : vector<128xf32>
    %12 = vector.multi_reduction <add>, %11, %cst_9 [0] : vector<32x128xf32> to vector<128xf32>
    %13 = vector.shape_cast %12 : vector<128xf32> to vector<1x128xf32>
    %c0_10 = arith.constant 0 : index
    %c0_11 = arith.constant 0 : index
    %14 = vector.load %arg6[%c0_10, %c0_11] : memref<1x1xf32, #tpu.memory_space<vmem>>, vector<1x1xf32>
    %15 = vector.broadcast %14 : vector<1x1xf32> to vector<1x128xf32>
    %16 = arith.addf %13, %15 : vector<1x128xf32>
    %c0_12 = arith.constant 0 : index
    %c0_13 = arith.constant 0 : index
    %c0_14 = arith.constant 0 : index
    %17 = vector.load %arg7[%c0_12, %c0_13, %c0_14] : memref<1x1x128xf32, #tpu.memory_space<vmem>>, vector<1x1x128xf32>
    %18 = vector.shape_cast %17 : vector<1x1x128xf32> to vector<1x128xf32>
    %19 = vector.shape_cast %16 : vector<1x128xf32> to vector<1x1x128xf32>
    tpu.vector_store %arg7[%c0_12, %c0_13, %c0_14], %19 {strides = array<i32>} : memref<1x1x128xf32, #tpu.memory_space<vmem>>, vector<1x1x128xf32>,
    return
  }
  func.func @transform_0(%arg0: i32, %arg1: i32) -> (i32, i32, i32) {
    %c0_i32 = arith.constant 0 : i32
    %c0_i32_0 = arith.constant 0 : i32
    return %arg0, %c0_i32, %arg1 : i32, i32, i32
  }
  func.func @transform_1(%arg0: i32, %arg1: i32) -> (i32, i32) {
    %c0_i32 = arith.constant 0 : i32
    %c0_i32_0 = arith.constant 0 : i32
    %c0_i32_1 = arith.constant 0 : i32
    return %c0_i32, %c0_i32_0 : i32, i32
  }
  func.func @transform_2(%arg0: i32, %arg1: i32) -> (i32, i32) {
    %c0_i32 = arith.constant 0 : i32
    %c0_i32_0 = arith.constant 0 : i32
    %c0_i32_1 = arith.constant 0 : i32
    return %c0_i32, %c0_i32_0 : i32, i32
  }
  func.func @transform_3(%arg0: i32, %arg1: i32) -> (i32, i32) {
    %c0_i32 = arith.constant 0 : i32
    %c0_i32_0 = arith.constant 0 : i32
    %c0_i32_1 = arith.constant 0 : i32
    return %c0_i32, %c0_i32_0 : i32, i32
  }
  func.func @transform_4(%arg0: i32, %arg1: i32) -> (i32, i32) {
    %c0_i32 = arith.constant 0 : i32
    %c0_i32_0 = arith.constant 0 : i32
    %c0_i32_1 = arith.constant 0 : i32
    return %c0_i32, %c0_i32_0 : i32, i32
  }
  func.func @transform_5(%arg0: i32, %arg1: i32) -> (i32, i32, i32) {
    %c0_i32 = arith.constant 0 : i32
    %c0_i32_0 = arith.constant 0 : i32
    return %arg0, %c0_i32, %arg1 : i32, i32, i32
  }
}

</mosaic_0001>

<bundles_post_ra>
// kernel: tpu_custom_call.1
= control target key start
LH: loop header
LB: loop body
LE: loop exit
PB: predicated region body
PF: predicated region fallthrough
CT: control target
= control target key end

     0   :  { %s1106_s0 = inlined_call_operand.hbm [shape: f32[2,64,256], index: 0, kind: input, shape index: {}]   ;;  %s1107_s1 = inlined_call_operand.vmem [shape: f32[32,64], index: 1, kind: input, shape index: {}]   ;;  %s1108_s2 = inlined_call_operand.vmem [shape: f32[32,1], index: 2, kind: input, shape index: {}]   ;;  %s1109_s3 = inlined_call_operand.vmem [shape: f32[32,1], index: 3, kind: input, shape index: {}]   ;;  %s1110_s4 = inlined_call_operand.<no memory space> [shape: f32[1,1], index: 4, kind: input, shape index: {}]   ;;  %s1111_s5 = inlined_call_operand.hbm [shape: f32[2,1,256], index: 5, kind: output, shape index: {}]  }
   0x1   :  { %v10_v0 = vstv %s1110_s4 }
   0x2   :  { %11 = vst [vmem:[#allocation2] sm:$0x1] %v10_v0 }
   0x3   :  { %12 = vsyncpa [#allocation4], 0 }
   0x4   :  { %14 = vsyncpa [#allocation4 + $0x1], 0 }
   0x5   :  { %15 = vsyncpa [#allocation5], 0 }
   0x6   :  { %17 = vsyncpa [#allocation5 + $0x1], 0  ;;  %s872_s20 = smov 0   ;;  %s874_s21 = smov 0  }
   0x7   :  { %s876_s22 = smov 0   ;;  %s878_s23 = smov 0  }
   0x8   :  { %s880_s24 = smov 0   ;;  %s882_s25 = smov 0  }
   0x9   :  { %s884_s26 = smov 0   ;;  %s886_s4 = smov 0  }
   0xa LB: > { %s544_s27 = sadd.s32 4294967295, %s831_s4   ;;  %s545_s28 = sadd.s32 4294967294, %s831_s4   ;;  %s831_s4 = sphi %s886_s4, %s23_s4   ;;  %s827_s26 = sphi %s884_s26, %s1132_s26   ;;  %s823_s25 = sphi %s882_s25, %s1131_s25   ;;  %s819_s24 = sphi %s880_s24, %s1130_s24   ;;  %s815_s23 = sphi %s878_s23, %s1129_s23   ;;  %s811_s22 = sphi %s876_s22, %s1128_s22   ;;  %s807_s21 = sphi %s874_s21, %s1127_s21   ;;  %s803_s20 = sphi %s872_s20, %s1126_s20  }
   0xb   : > { %s32_s29 = sadd.s32 1, %s823_s25  ;;  %s35_s30 = sadd.s32 1, %s827_s26 }
   0xc   : > { %p33_p0 = scmp.ge.s32.totalorder %s32_s29, 2  ;;  %s44_s6 = sadd.s32 1, %s811_s22 }
   0xd   : > { %p51_p1 = scmp.ne.s32.totalorder %s811_s22, %s807_s21  ;;  %p52_p2 = scmp.eq.s32.totalorder %s831_s4, 0 }
   0xe   : > { %s1134_s29 = smov (%p33_p0, %s32_s29), 0  ;;  %s1136_s30 = smov (!%p33_p0, %s35_s30), %s827_s26 }
   0xf   : > { %1115 = sst [smem:[#allocation9_spill]] %s1134_s29  ;;  %s40_s7 = ssub.s32 %s823_s25, %s1134_s29 }
  0x10   : > { %p925_p3 = por %p52_p2, %p51_p1  ;;  %p37_p4 = scmp.ge.s32.totalorder %s1136_s30, 2 }
  0x11   : > { %p57_p5 = scmp.ne.s32.totalorder %s807_s21, %s803_s20  ;;  %p58_p6 = scmp.eq.s32.totalorder %s544_s27, 0 }
  0x12   : > { %p167_p7 = scmp.eq.s32.totalorder %s544_s27, 3  ;;  %s1138_s30 = smov (%p37_p4, %s1136_s30), 0 }
  0x13   : > { %1117 = sst [smem:[#allocation10_spill]] %s1138_s30  ;;  %p933_p8 = por %p58_p6, %p57_p5 }
  0x14   : > { %p937_p9 = por %p167_p7, %p51_p1  ;;  %s39_s11 = ssub.s32 %s827_s26, %s1138_s30 }
  0x15   : > { %p173_p10 = scmp.eq.s32.totalorder %s545_s28, 3  ;;  %s41_s12 = sor.u32 %s40_s7, %s39_s11 }
  0x16   : > { %s1119_s10 = scalar_select %p937_p9, 1, 0 }
  0x17   : > { %p42_p11 = scmp.eq.s32.totalorder %s41_s12, 0  ;;  %p943_p12 = por %p173_p10, %p57_p5 }
  0x18   : > { %p631_p13 = scmp.lt.s32.totalorder %s831_s4, 4  ;;  %s205_s14 = sand.u32 1, %s811_s22  }
  0x19   : > { %s1120_s13 = scalar_select %p943_p12, 1, 0 }
  0x1a   : > { %s950_s15 = scalar_select %p42_p11, %s811_s22, %s44_s6  }
  0x1b   : > { %s548_s16 = sshll.u32 %s205_s14, 6  ;;  %s549_s17 = sshll.u32 %s827_s26, 4 }
  0x1c   : > { %s214_s18 = sadd.s32 %s823_s25, %s549_s17  ;;  %s209_s19 = scalar_lea.vmem [#allocation3], %s548_s16 }
  0x1d   : > { %s217_s27 = sshll.u32 %s209_s19, 4  ;;  %s550_s29 = sshll.u32 %s214_s18, 7  ;;  %s954_s27 = int_to_ptr.vmem [resolvable:$true] %s217_s27 }
  0x1e   : > { %s959_s7 = scalar_lea.hbm %s1106_s0, %s550_s29  ;;  %p963_p0 = pnand %p631_p13, %p925_p3 }
  0x1f   : > { %s967_s11 = scalar_lea.sflag [#allocation4], %s205_s14  ;;  %s703_s12 = scalar_lea.hbm %s959_s7, 1024 }
  0x20   : > { %p704_p1 = scmp.ne.s32.totalorder %s959_s7, %s703_s12  ;;  %p705_p2 = pneg %p963_p0 }
  0x21   : > { %s708_s8 = scalar_lea.hbm %s1106_s0, 4096  ;;  %p709_p3 = scmp.lt.u32.totalorder %s959_s7, %s1106_s0 }
  0x22   : > { %p706_p4 = pnand %p705_p2, %p704_p1  ;;  %p710_p6 = scmp.lt.u32.totalorder %s708_s8, %s703_s12 }
  0x23   : > { %p712_p10 = scmp.lt.u32.totalorder %s703_s12, %s959_s7 }
  0x24   : > { %p707_p5 = pneg %p706_p4  ;;  %p711_p7 = por %p710_p6, %p709_p3 }
  0x26   : > { %p713_p11 = por %p712_p10, %p711_p7 }
  0x28   : > { %p714_p13 = pnand %p713_p11, %p707_p5 }
  0x2a   : > { %717 = shalt.err (!%p714_p13)
}
  0x2b   : > { %s718_s14 = scalar_lea.vmem %s954_s27, 1024  ;;  %s833_s18 = smov [#allocation3]  }
  0x2c   : > { %p719_p1 = scmp.ne.s32.totalorder %s954_s27, %s718_s14  ;;  %s723_s19 = sshll.u32 %s833_s18, 4  ;;  %s724_s19 = int_to_ptr.vmem [resolvable:$false] %s723_s19 }
  0x2d   : > { %s725_s28 = scalar_lea.vmem %s724_s19, 2048  ;;  %p726_p9 = scmp.lt.s32.totalorder %s954_s27, %s724_s19 }
  0x2e   : > { %p721_p4 = pnand %p719_p1, %p705_p2  ;;  %p727_p3 = scmp.lt.s32.totalorder %s725_s28, %s718_s14 }
  0x30   : > { %p722_p12 = pneg %p721_p4  ;;  %p728_p6 = por %p727_p3, %p726_p9 }
  0x32   : > { %p729_p7 = pnand %p728_p6, %p722_p12 }
  0x34   : > { %732 = shalt.err (!%p729_p7)
}
  0x35   : > { %s834_s12 = smov 256   ;;  %s835_s29 = smov 128  }
  0x36   : > { %s836_s30 = smov 8   ;;  %p551_p2 = scmp.ge.s32.totalorder %s831_s4, 1 }
  0x37   : > { %626 = dma.hbm_to_vmem [thread:$0]  (!%p963_p0), %s959_s7, 1024, %s954_s27, %s967_s11, %s834_s12, %s835_s29, %s836_s30  }
  0x38   : > { %p225_p5 = scmp.lt.s32.totalorder %s831_s4, 5 }
  0x3a   : > { %p226_p10 = pnand %p551_p2, %p225_p5 }
  0x3b   : > { %s998_s8 = sand.u32 (!%p226_p10), 1, %s807_s21  }
  0x3c   : > { %229 = sbr.rel (%p226_p10) target bundleno = 340 (0x154), region = 40  ;;  %s552_s16 = sshll.u32 (!%p226_p10), %s998_s8, 6 }
  0x3d   : > { %s232_s17 = scalar_lea.sflag (!%p226_p10), [#allocation4], %s998_s8  ;;  %s235_s14 = scalar_lea.vmem (!%p226_p10), [#allocation3], %s552_s16 }
  0x43   : > { %794 = dma.done.wait (%p933_p8), %s232_s17, 1024  }
  0x44   : > { %796 = vsyncadd (%p933_p8), %s232_s17, 4294966272  ;;  %v837_v1 = vmov 0   ;;  %v265_v2 = vld [vmem:[%s235_s14] sm:$0xff]  ;;  %v266_v3 = vld [vmem:[%s235_s14 + $0x8] sm:$0xff]  ;;  %vm297_vm0 = vcmask 523264   ;;  %v442_v53 = vlaneseq  ;;  %s557_s30 = sshll.u32 %s819_s24, 1 }
  0x45   : > { %701 = vset.pattern.permute.xlu0 %v837_v1  ;;  %702 = vset.pattern.permute.xlu1 %v837_v1  ;;  %v267_v4 = vld [vmem:[%s235_s14 + $0x10] sm:$0xff]  ;;  %v595_v5 = vpack.c.bf16 %v266_v3, %v265_v2  ;;  %v268_v6 = vld [vmem:[%s235_s14 + $0x18] sm:$0xff]  ;;  %v269_v8 = vld [vmem:[%s235_s14 + $0x20] sm:$0xff]  ;;  %s459_s16 = sadd.s32 %s815_s23, %s557_s30  ;;  %s449_s23 = scalar_lea.sflag [#allocation5], %s998_s8 }
  0x46   : > { %v599_v7 = vpack.c.bf16 %v268_v6, %v267_v4  ;;  %v270_v9 = vld [vmem:[%s235_s14 + $0x28] sm:$0xff]  ;;  %v261_v10 = vld [vmem:[%s1107_s1] sm:$0xff]  ;;  %v271_v15 = vld [vmem:[%s235_s14 + $0x30] sm:$0xff]  ;;  %v443_v56 = vshrl.u32 %v442_v53, 7  ;;  %s558_s17 = sshll.u32 %s459_s16, 4  ;;  %p1122_p9 = scmp.ne.s32.totalorder %s1119_s10, 0 }
  0x47   : > { %596 = vmatprep.subr.bf16.mxu0 %v595_v5  ;;  %611 = vmatprep.subr.bf16.mxu1 %v595_v5  ;;  %v263_v11 = vld [vmem:[%s1107_s1 + $0x10] sm:$0xff]  ;;  %v273_v12 = vld [vmem:[%s1108_s2] sm:$0xff]  ;;  %v603_v14 = vpack.c.bf16 %v270_v9, %v269_v8  ;;  %v274_v17 = vld [vmem:[%s1108_s2 + $0x8] sm:$0xff]  ;;  %s1052_s6 = scalar_lea.hbm %s1111_s5, %s558_s17  ;;  %s838_s11 = smov [#allocation6]  }
  0x48   : > { %598 = vmatpush3.bf16.msra.mxu0 %v595_v5  ;;  %615 = vmatpush3.bf16.msra.mxu1 %v595_v5  ;;  %v275_v13 = vld [vmem:[%s1108_s2 + $0x10] sm:$0xff]  ;;  %v272_v16 = vld [vmem:[%s235_s14 + $0x38] sm:$0xff]  ;;  %v400_v21 = vld [vmem:[%s1109_s3 + $0x8] sm:$0xff]  ;;  %v444_v59 = vsub.s32 0, %v443_v56  ;;  %s260_s14 = scalar_lea.vmem [#allocation6], %s998_s8  ;;  %s737_s18 = sshll.u32 %s838_s11, 4  ;;  %s738_s18 = int_to_ptr.vmem [resolvable:$false] %s737_s18 }
  0x49   : > { %600 = vmatprep.subr.bf16.mxu0 %v599_v7  ;;  %612 = vmatprep.subr.bf16.mxu1 %v599_v7  ;;  %v276_v18 = vld [vmem:[%s1108_s2 + $0x18] sm:$0xff]  ;;  %v607_v19 = vpack.c.bf16 %v272_v16, %v271_v15  ;;  %v399_v20 = vld [vmem:[%s1109_s3] sm:$0xff]  ;;  %v262_v22 = vld [vmem:[%s1107_s1 + $0x8] sm:$0xff]  ;;  %s463_s27 = sshll.u32 %s260_s14, 4  ;;  %s739_s19 = scalar_lea.vmem %s738_s18, 32  ;;  %s1054_s27 = int_to_ptr.vmem [resolvable:$true] %s463_s27 }
  0x4a   : > { %589 = vmatprep.mubr.msk.f32.mxu0 %vm297_vm0, %v261_v10  ;;  %592 = vmatprep.mubr.msk.f32.mxu1 %vm297_vm0, %v263_v11  ;;  %v264_v23 = vld [vmem:[%s1107_s1 + $0x18] sm:$0xff]  ;;  %v401_v24 = vld [vmem:[%s1109_s3 + $0x10] sm:$0xff]  ;;  %v436_v26 = vld [vmem:[#allocation2] sm:$0x1]  ;;  %s733_s24 = scalar_lea.vmem %s1054_s27, 16  ;;  %p740_p11 = scmp.lt.s32.totalorder %s1054_s27, %s738_s18 }
  0x4b   : > { %279 = vperm.xlu0 %701, %v273_v12   ;;  %289 = vperm.xlu1 %702, %v275_v13   ;;  %v402_v25 = vld [vmem:[%s1109_s3 + $0x18] sm:$0xff]  ;;  %p734_p8 = scmp.ne.s32.totalorder %s1054_s27, %s733_s24  ;;  %p741_p13 = scmp.lt.s32.totalorder %s739_s19, %s733_s24 }
  0x4c   : > { %602 = vmatpush3.bf16.msra.mxu0 %v599_v7  ;;  %616 = vmatpush3.bf16.msra.mxu1 %v599_v7 }
  0x4d   : > { %604 = vmatprep.subr.bf16.mxu0 %v603_v14  ;;  %613 = vmatprep.subr.bf16.mxu1 %v603_v14  ;;  %p735_p12 = pnand %p734_p8, %p1122_p9  ;;  %p742_p1 = por %p741_p13, %p740_p11 }
  0x4f   : > { %284 = vperm.xlu0 %701, %v274_v17   ;;  %294 = vperm.xlu1 %702, %v276_v18   ;;  %p736_p0 = pneg %p735_p12 }
  0x50   : > { %606 = vmatpush3.bf16.msra.mxu0 %v603_v14  ;;  %617 = vmatpush3.bf16.msra.mxu1 %v603_v14 }
  0x51   : > { %608 = vmatprep.subr.bf16.mxu0 %v607_v19  ;;  %614 = vmatprep.subr.bf16.mxu1 %v607_v19  ;;  %p743_p4 = pnand %p742_p1, %p736_p0 }
  0x53   : > { %405 = vperm.xlu0 %701, %v399_v20   ;;  %410 = vperm.xlu1 %702, %v400_v21  }
  0x54   : > { %610 = vmatpush3.bf16.msra.mxu0 %v607_v19  ;;  %618 = vmatpush3.bf16.msra.mxu1 %v607_v19 }
  0x57   : > { %590 = vmatmul.mubr.msk.f32.vlgmr.msra.gmra.mrb[0].mxu0 %vm297_vm0, %v262_v22  ;;  %593 = vmatmul.mubr.msk.f32.vlgmr.msra.gmra.mrb[0].mxu1 %vm297_vm0, %v264_v23 }
  0x58   : > { %415 = vperm.xlu0 %701, %v401_v24   ;;  %420 = vperm.xlu1 %702, %v402_v25  }
  0x5c   : > { %439 = vperm.xlu0 %701, %v436_v26  }
  0xca   : > { %v280_v27 = vpop.permute.xlu0 %279  ;;  %v290_v28 = vpop.permute.xlu1 %289 }
  0xce   : > { %v285_v29 = vpop.permute.xlu0 %284  ;;  %v295_v30 = vpop.permute.xlu1 %294 }
  0xd2   : > { %v406_v31 = vpop.permute.xlu0 %405  ;;  %v411_v40 = vpop.permute.xlu1 %410 }
  0xd7   : > { %v416_v47 = vpop.permute.xlu0 %415  ;;  %v421_v50 = vpop.permute.xlu1 %420 }
  0xdb   : > { %v440_v61 = vpop.permute.xlu0 %439 }
  0xdc   : > { %v445_v63 = vrot.slane %v440_v61, %v444_v59 }
 0x12a   : > { %v591_v32 = vpop.f32.mrb[0].mxu0  ;;  %v594_v33 = vpop.f32.mrb[0].mxu1 }
 0x12b   : > { %v382_v34 = vadd.f32 %v591_v32, %v285_v29  ;;  %v376_v35 = vpop.f32.mrb[1].mxu0  ;;  %v386_v36 = vpop.f32.mrb[1].mxu1  ;;  %v392_v37 = vadd.f32 %v594_v33, %v295_v30 }
 0x12c   : > { %v377_v38 = vadd.f32 %v376_v35, %v280_v27  ;;  %v387_v39 = vadd.f32 %v386_v36, %v290_v28 }
 0x12d   : > { %v396_v41 = vmax.f32 %v382_v34, 0.0  ;;  %v398_v45 = vmax.f32 %v392_v37, 0.0 }
 0x12e   : > { %v395_v42 = vmax.f32 %v377_v38, 0.0  ;;  %v397_v43 = vmax.f32 %v387_v39, 0.0 }
 0x12f   : > { %v424_v44 = vmul.f32 %v411_v40, %v396_v41  ;;  %v426_v51 = vmul.f32 %v421_v50, %v398_v45 }
 0x130   : > { %v423_v46 = vmul.f32 %v406_v31, %v395_v42  ;;  %v425_v49 = vmul.f32 %v416_v47, %v397_v43 }
 0x132   : > { %v427_v48 = vadd.f32 %v424_v44, %v423_v46 }
 0x134   : > { %v428_v52 = vadd.f32 %v427_v48, %v425_v49 }
 0x136   : > { %v429_v54 = vadd.f32 %v428_v52, %v426_v51 }
 0x138   : > { %v430_v55 = vrot.slane %v429_v54, 4 }
 0x13a   : > { %v431_v57 = vadd.f32 %v430_v55, %v429_v54 }
 0x13c   : > { %v432_v58 = vrot.slane %v431_v57, 2 }
 0x13e   : > { %v433_v60 = vadd.f32 %v432_v58, %v431_v57 }
 0x140   : > { %v434_v62 = vrot.slane %v433_v60, 1 }
 0x142   : > { %v435_v0 = vadd.f32 %v434_v62, %v433_v60 }
 0x144   : > { %v446_v1 = vadd.f32 %v445_v63, %v435_v0 }
 0x146   : > { %447 = vst [vmem:[%s260_s14] sm:$0x1] %v446_v1 }
 0x147   : > { %746 = shalt.err (!%p743_p4)
}
 0x148   : > { %s747_s8 = scalar_lea.hbm %s1052_s6, 16  ;;  %s751_s29 = scalar_lea.hbm %s1111_s5, 64 }
 0x149   : > { %p748_p3 = scmp.ne.s32.totalorder %s1052_s6, %s747_s8  ;;  %p752_p2 = scmp.lt.u32.totalorder %s1052_s6, %s1111_s5 }
 0x14a   : > { %p753_p5 = scmp.lt.u32.totalorder %s751_s29, %s747_s8  ;;  %p755_p8 = scmp.lt.u32.totalorder %s747_s8, %s1052_s6 }
 0x14b   : > { %p749_p6 = pnand %p748_p3, %p1122_p9 }
 0x14c   : > { %p754_p10 = por %p753_p5, %p752_p2 }
 0x14d   : > { %p750_p7 = pneg %p749_p6 }
 0x14e   : > { %p756_p12 = por %p755_p8, %p754_p10 }
 0x150   : > { %p757_p0 = pnand %p756_p12, %p750_p7 }
 0x152   : > { %760 = shalt.err (!%p757_p0)
}
 0x153   : > { %621 = dma.vmem_to_hbm [thread:$0]  (%p1122_p9), %s1054_s27, 16, %s1052_s6, %s449_s23  }
 0x154 PF: > { %p632_p11 = scmp.ge.s32.totalorder %s831_s4, 2  ;;  %s475_s17 = sand.u32 1, %s803_s20  }
 0x155   : > { %p1123_p13 = scmp.ne.s32.totalorder %s1120_s13, 0  ;;  %s476_s14 = scalar_lea.sflag [#allocation5], %s475_s17 }
 0x157   : > { %p628_p1 = pnand %p632_p11, %p1123_p13 }
 0x159   : > { %798 = dma.done.wait (!%p628_p1), %s476_s14, 16  }
 0x15a   : > { %800 = vsyncadd (!%p628_p1), %s476_s14, 4294967280  ;;  %s23_s4 = sadd.s32 1, %s831_s4   ;;  %s1124_s10 = sld [smem:[#allocation9_spill]] }
 0x15b   : > { %p20_p4 = scmp.ge.s32.totalorder %s23_s4, 6   ;;  %s1125_s27 = sld [smem:[#allocation10_spill]] }
 0x15c   : > { %s1126_s20 = smov %s807_s21  ;;  %s1127_s21 = smov %s811_s22 }
 0x15d   : > { %s1128_s22 = smov %s950_s15  ;;  %s1129_s23 = smov %s823_s25 }
 0x15e   : > { %s1130_s24 = smov %s827_s26  ;;  %22 = sbr.rel (!%p20_p4) target bundleno = 10 (0xa), region = 85 }
 0x160   : > { %s1131_s25 = smov %s1124_s10 }
 0x161   : > { %s1132_s26 = smov %s1125_s27 }
 0x165   :  { %480 = vsyncpa [#allocation4], 1 }
 0x166   :  { %482 = vsyncpa [#allocation4 + $0x1], 1 }
 0x167   :  { %483 = vsyncpa [#allocation5], 1 }
 0x168   :  { %485 = vsyncpa [#allocation5 + $0x1], 1 }

</bundles_post_ra>
